<compile_context>
chip_gen: v5e
topology: v5e:2x2
jax: 0.10.0
libtpu: 0.0.40
codegen_flags: <defaults>
</compile_context>

<pallas_src>
import functools

import jax
import jax.numpy as jnp
from jax.experimental import pallas as pl
from jax.experimental.pallas import tpu as pltpu


def _round_up(x: int, m: int) -> int:
    return ((x + m - 1) // m) * m


def _cdiv(a: int, b: int) -> int:
    return -(-a // b)


# Sublane multiple by element size (f32 -> 8, bf16 -> 16, int8 -> 32).
_SUBLANE = {4: 8, 2: 16, 1: 32}


def _vmem_budgets():
    """(per-input-tile byte budget, scoped VMEM limit) per TPU generation."""
    try:
        cap = getattr(pltpu.get_tpu_info(), "vmem_capacity_bytes", 64 * 2**20)
    except Exception:
        cap = 64 * 2**20
    if cap >= 100 * 2**20:
        # v5e / v6e: 128 MiB physical VMEM -> big tiles, generous scoped limit.
        return 16 * 2**20, 80 * 2**20
    # v7x: 64 MiB physical VMEM -> ~8 MiB tiles keep 2x double-buffered
    # inputs + scratch well under a 48 MiB scoped limit.
    return 8 * 2**20, 48 * 2**20


def _accumulate_lane_folded(x_ref, acc_ref, valid):
    """Fold the tile's lanes into the lane-dense (tr, 128) f32 accumulator.

    `valid` is the STATIC number of valid lanes in this tile (<= tk). 128-lane
    columns are added elementwise (VPU only); only the single ragged boundary
    column is masked; fully out-of-range columns are skipped entirely. The
    cross-lane (XLU) reduce happens once at the end of the whole reduction.
    """
    tr, tk = x_ref.shape
    folded = None
    for lo in range(0, tk, 128):
        if lo >= valid:
            break  # fully out-of-range lane column: skip the load
        xj = x_ref[:, lo:lo + 128].astype(jnp.float32)
        if lo + 128 > valid:  # ragged boundary column: mask OOB lanes
            lane = jax.lax.broadcasted_iota(jnp.int32, (tr, 128), 1)
            xj = jnp.where(lane < (valid - lo), xj, 0.0)
        folded = xj if folded is None else folded + xj
    acc_ref[...] += folded


def _spatial_mean_kernel(x_ref, o_ref, acc_ref, *, rem_lanes, num_k, inv_hw):
    """Per-(batch*channel)-row spatial mean.

    x_ref:   (tr, tk) input tile in VMEM
    o_ref:   (tr, 1)  output tile (same block across the hw grid axis)
    acc_ref: (tr, 128) lane-dense f32 VMEM scratch accumulator
    rem_lanes / num_k / inv_hw are static (trace-time) constants.
    """
    k = pl.program_id(1)
    tk = x_ref.shape[1]

    @pl.when(k == 0)
    def _():
        acc_ref[...] = jnp.zeros_like(acc_ref)

    if rem_lanes == tk:
        # hw divides evenly into tk-lane tiles: every step is a full tile.
        _accumulate_lane_folded(x_ref, acc_ref, valid=tk)
    elif num_k == 1:
        # Single (ragged) reduction step: always masked at the boundary.
        _accumulate_lane_folded(x_ref, acc_ref, valid=rem_lanes)
    else:
        @pl.when(k < num_k - 1)
        def _():
            _accumulate_lane_folded(x_ref, acc_ref, valid=tk)

        @pl.when(k == num_k - 1)
        def _():
            _accumulate_lane_folded(x_ref, acc_ref, valid=rem_lanes)

    @pl.when(k == num_k - 1)
    def _():
        # One cross-lane (XLU) reduce + one narrow store per row tile.
        total = jnp.sum(acc_ref[...], axis=-1, keepdims=True)
        o_ref[...] = (total * inv_hw).astype(o_ref.dtype)


def channel_attention(x, *, row_tile: int = 256, tile_bytes=None,
                      min_pallas_bytes: int = 1 << 20):
    """AdaptiveAvgPool2d(1) on NCHW input: (B, C, H, W) -> (B, C, 1, 1)."""
    B, C, H, W = x.shape
    rows, hw = B * C, H * W
    itemsize = jnp.dtype(x.dtype).itemsize

    # Tiny tensors: pallas_call launch overhead dominates; XLA's reduce wins.
    if rows * hw * itemsize < min_pallas_bytes:
        return jnp.mean(x, axis=(2, 3), keepdims=True)

    x2d = x.reshape(rows, hw)
    sub = _SUBLANE.get(itemsize, 8)

    per_tile_bytes, vmem_limit = _vmem_budgets()
    if tile_bytes is not None:
        per_tile_bytes = tile_bytes

    # --- Row tile: balanced split of the sublane-aligned row extent. --------
    rows_r = _round_up(rows, sub)
    cap_tr = _round_up(min(row_tile, rows_r), sub)
    n_i = _cdiv(rows_r, cap_tr)
    tr = _round_up(_cdiv(rows_r, n_i), sub)

    # --- hw tile: byte-budgeted, divisor-aware, 128-lane aligned. -----------
    hw_r = _round_up(hw, 128)
    max_tk = max(128, (per_tile_bytes // (tr * itemsize)) // 128 * 128)
    if hw_r <= max_tk:
        tk = hw_r                       # single reduction step, no carries
    else:
        n_k = _cdiv(hw_r, max_tk)
        tk = _round_up(_cdiv(hw_r, n_k), 128)   # near-even split

    num_k = _cdiv(hw, tk)
    rem_lanes = hw - (num_k - 1) * tk   # valid lanes in the last hw tile
    grid = (_cdiv(rows, tr), num_k)

    kernel = functools.partial(
        _spatial_mean_kernel,
        rem_lanes=rem_lanes, num_k=num_k, inv_hw=1.0 / hw,
    )

    out2d = pl.pallas_call(
        kernel,
        out_shape=jax.ShapeDtypeStruct((rows, 1), x.dtype),
        grid_spec=pltpu.PrefetchScalarGridSpec(
            num_scalar_prefetch=0,
            grid=grid,
            # Default double-buffering; consider pipeline_mode=pl.Buffered(3)
            # on v7x if traces show DMA gaps between steps.
            in_specs=[pl.BlockSpec((tr, tk), lambda i, k: (i, k))],
            out_specs=pl.BlockSpec((tr, 1), lambda i, k: (i, 0)),
            scratch_shapes=[pltpu.VMEM((tr, 128), jnp.float32)],
        ),
        compiler_params=pltpu.CompilerParams(
            dimension_semantics=("parallel", "arbitrary"),
            vmem_limit_bytes=vmem_limit,
        ),
    )(x2d)

    # Note: the spec module is avg-pool only. If this ever feeds a full
    # SE-style block (FC -> sigmoid -> scale), fuse the gating multiply into a
    # second pass reusing this tiling to avoid a second full HBM read of x.
    return out2d.reshape(B, C, 1, 1)


if __name__ == "__main__":
    key = jax.random.PRNGKey(0)

    # 1) Primary small test (module-implied shapes); force the Pallas path.
    B, C, H, W = 2, 4, 16, 16
    x = jax.random.normal(key, (B, C, H, W), dtype=jnp.float32)
    out = channel_attention(x, min_pallas_bytes=0)
    jax.block_until_ready(out)
    ref = jnp.mean(x, axis=(2, 3), keepdims=True)
    assert out.shape == (B, C, 1, 1)
    assert jnp.allclose(out, ref, atol=1e-5, rtol=1e-5)

    # 1b) Same input through the default tiny-input short-circuit path.
    out_sc = channel_attention(x)
    jax.block_until_ready(out_sc)
    assert jnp.allclose(out_sc, ref, atol=1e-5, rtol=1e-5)

    # 2) Ragged shape: rows not a multiple of 8, H*W not a multiple of 128.
    #    Exercises partial blocks + in-kernel boundary masking (no host pad).
    x2 = jax.random.normal(jax.random.PRNGKey(0), (2, 3, 15, 10),
                           dtype=jnp.float32)
    out2 = channel_attention(x2, min_pallas_bytes=0)
    jax.block_until_ready(out2)
    ref2 = jnp.mean(x2, axis=(2, 3), keepdims=True)
    assert out2.shape == (2, 3, 1, 1)
    assert jnp.allclose(out2, ref2, atol=1e-5, rtol=1e-5)

    # 3) bf16, multi-step reduction with ragged tail hw tile and a partial
    #    trailing row block (small tile_bytes forces several k steps).
    x3 = jax.random.normal(jax.random.PRNGKey(0), (2, 9, 33, 33),
                           dtype=jnp.bfloat16)
    out3 = channel_attention(x3, min_pallas_bytes=0, tile_bytes=16 * 1024,
                             row_tile=8)
    jax.block_until_ready(out3)
    ref3 = jnp.mean(x3.astype(jnp.float32), axis=(2, 3), keepdims=True)
    assert out3.shape == (2, 9, 1, 1)
    assert jnp.allclose(out3.astype(jnp.float32), ref3, atol=1e-2)

    print("KERNEL_OK")
</pallas_src>

<mosaic_0001>
module attributes {stable_mosaic.version = 11 : i64} {
  func.func @_spatial_mean_kernel(%arg0: i32, %arg1: i32, %arg2: memref<8x256xf32, #tpu.memory_space<vmem>>, %arg3: memref<8x1xf32, #tpu.memory_space<vmem>>, %arg4: memref<8x128xf32, #tpu.memory_space<vmem>>) attributes {dimension_semantics = [#tpu.dimension_semantics<parallel>, #tpu.dimension_semantics<arbitrary>], iteration_bounds = array<i64: 1, 1>, scalar_prefetch = 0 : i64, scratch_operands = 1 : i64, tpu.core_type = #tpu.core_type<tc>, window_params = [{transform_indices = @transform_0, window_bounds = array<i64: 8, 256>}, {transform_indices = @transform_1, window_bounds = array<i64: 8, 1>}]} {
    %c0_i32 = arith.constant 0 : i32
    %0 = arith.cmpi eq, %arg1, %c0_i32 : i32
    %1 = arith.extui %0 : i1 to i32
    %c0_i32_0 = arith.constant 0 : i32
    %2 = arith.cmpi ne, %1, %c0_i32_0 : i32
    scf.if %2 {
      %cst = arith.constant 0.000000e+00 : f32
      %12 = vector.broadcast %cst : f32 to vector<8x128xf32>
      %c0_9 = arith.constant 0 : index
      %c0_10 = arith.constant 0 : index
      %13 = vector.load %arg4[%c0_9, %c0_10] : memref<8x128xf32, #tpu.memory_space<vmem>>, vector<8x128xf32>
      tpu.vector_store %arg4[%c0_9, %c0_10], %12 {strides = array<i32>} : memref<8x128xf32, #tpu.memory_space<vmem>>, vector<8x128xf32>,
    } else {
    }
    %c0 = arith.constant 0 : index
    %c0_1 = arith.constant 0 : index
    %3 = vector.load %arg2[%c0, %c0_1] : memref<8x256xf32, #tpu.memory_space<vmem>>, vector<8x128xf32>
    %c0_2 = arith.constant 0 : index
    %c128 = arith.constant 128 : index
    %4 = vector.load %arg2[%c0_2, %c128] : memref<8x256xf32, #tpu.memory_space<vmem>>, vector<8x128xf32>
    %5 = arith.addf %3, %4 : vector<8x128xf32>
    %c0_3 = arith.constant 0 : index
    %c0_4 = arith.constant 0 : index
    %6 = vector.load %arg4[%c0_3, %c0_4] : memref<8x128xf32, #tpu.memory_space<vmem>>, vector<8x128xf32>
    %7 = arith.addf %6, %5 : vector<8x128xf32>
    %c0_5 = arith.constant 0 : index
    %c0_6 = arith.constant 0 : index
    %8 = vector.load %arg4[%c0_5, %c0_6] : memref<8x128xf32, #tpu.memory_space<vmem>>, vector<8x128xf32>
    tpu.vector_store %arg4[%c0_5, %c0_6], %7 {strides = array<i32>} : memref<8x128xf32, #tpu.memory_space<vmem>>, vector<8x128xf32>,
    %c0_i32_7 = arith.constant 0 : i32
    %9 = arith.cmpi eq, %arg1, %c0_i32_7 : i32
    %10 = arith.extui %9 : i1 to i32
    %c0_i32_8 = arith.constant 0 : i32
    %11 = arith.cmpi ne, %10, %c0_i32_8 : i32
    scf.if %11 {
      %c0_9 = arith.constant 0 : index
      %c0_10 = arith.constant 0 : index
      %12 = vector.load %arg4[%c0_9, %c0_10] : memref<8x128xf32, #tpu.memory_space<vmem>>, vector<8x128xf32>
      %cst = arith.constant dense<0.000000e+00> : vector<8xf32>
      %13 = vector.multi_reduction <add>, %12, %cst [1] : vector<8x128xf32> to vector<8xf32>
      %14 = vector.shape_cast %13 : vector<8xf32> to vector<8x1xf32>
      %cst_11 = arith.constant 3.906250e-03 : f32
      %15 = vector.broadcast %cst_11 : f32 to vector<8x1xf32>
      %16 = arith.mulf %14, %15 : vector<8x1xf32>
      %c0_12 = arith.constant 0 : index
      %c0_13 = arith.constant 0 : index
      %17 = vector.load %arg3[%c0_12, %c0_13] : memref<8x1xf32, #tpu.memory_space<vmem>>, vector<8x1xf32>
      tpu.vector_store %arg3[%c0_12, %c0_13], %16 {strides = array<i32>} : memref<8x1xf32, #tpu.memory_space<vmem>>, vector<8x1xf32>,
    } else {
    }
    return
  }
  func.func @transform_0(%arg0: i32, %arg1: i32) -> (i32, i32) {
    %c0_i32 = arith.constant 0 : i32
    return %arg0, %arg1 : i32, i32
  }
  func.func @transform_1(%arg0: i32, %arg1: i32) -> (i32, i32) {
    %c0_i32 = arith.constant 0 : i32
    %c0_i32_0 = arith.constant 0 : i32
    return %arg0, %c0_i32 : i32, i32
  }
}

</mosaic_0001>

<bundles_post_ra>
// kernel: tpu_custom_call.1
= control target key start
LH: loop header
LB: loop body
LE: loop exit
PB: predicated region body
PF: predicated region fallthrough
CT: control target
= control target key end

     0   :  { %6 = vsyncpa [#allocation4], 0  ;;  %s74_s9 = smov [#allocation3]   ;;  %s91_s0 = inlined_call_operand.hbm [shape: f32[8,256], index: 0, kind: input, shape index: {}]   ;;  %s92_s1 = inlined_call_operand.vmem [shape: f32[8,1], index: 1, kind: output, shape index: {}]  }
   0x1   :  { %s12_s8 = sshll.u32 %s91_s0, 4  ;;  %s14_s10 = sshll.u32 %s74_s9, 4  ;;  %s13_s8 = int_to_ptr.hbm [resolvable:$true] %s12_s8  ;;  %s15_s10 = int_to_ptr.vmem [resolvable:$true] %s14_s10 }
   0x2   :  { %17 = dma.hbm_to_vmem [thread:$0]  %s13_s8, 256, %s15_s10, [#allocation4]  }
   0x3   :  { %72 = dma.done.wait [#allocation4], 256  }
   0x4   :  { %73 = vsyncadd [#allocation4], 4294967040  ;;  %v27_v0 = vld [vmem:[#allocation3] sm:$0xff]  ;;  %v28_v1 = vld [vmem:[#allocation3 + $0x8] sm:$0xff]  ;;  %vm40_vm0 = vcmask 7168  }
   0x5   :  { %v29_v2 = vadd.f32 %v28_v1, %v27_v0 }
   0x7   :  { %37 = vadd.xlane.f32.xlu0 %v29_v2 }
  0x7a   :  { %v38_v3 = vpop.xlane.xlu0 %37 }
  0x7b   :  { %v39_v4 = vmul.f32 0.00390625, %v38_v3 }
  0x7d   :  { %41 = vst.msk [vmem:[%s92_s1] sm:$0xff] %vm40_vm0, %v39_v4 }
  0x7e   :  { %46 = vsyncpa [#allocation4], 1 }

</bundles_post_ra>
